<compile_context>
chip_gen: v5e
topology: v5e:2x2
jax: 0.10.0
libtpu: 0.0.40
codegen_flags: <defaults>
</compile_context>

<pallas_src>
import functools

import jax
import jax.numpy as jnp
from jax.experimental import pallas as pl
from jax.experimental.pallas import tpu as pltpu


def _cosface_kernel(labels_ref, logits_ref, out_ref, *, s, m, tile_c,
                    compute_dtype):
    # labels_ref: (TB, 1) int32 ; logits_ref/out_ref: (TB, TC) in caller dtype.
    # NOTE: garbage labels in padded rows of a partial batch tile are harmless
    # because Pallas discards padded output rows -- do not "fix" this into a
    # scatter.
    j = pl.program_id(1)                                   # class-tile index
    lbl = labels_ref[...]                                  # (TB, 1)
    lbl_local = lbl - j * tile_c                           # tile-local target col
    valid = lbl != -1                                      # (TB, 1)
    x = logits_ref[...].astype(compute_dtype)              # (TB, TC)
    col = jax.lax.broadcasted_iota(jnp.int32, x.shape, 1)  # local column index
    mask = (col == lbl_local) & valid
    margin = jnp.asarray(m, dtype=compute_dtype)
    scale = jnp.asarray(s, dtype=compute_dtype)
    y = jnp.where(mask, x - margin, x) * scale
    out_ref[...] = y.astype(out_ref.dtype)


def _tpu_config(dtype):
    """Pick (block_bytes, vmem_limit_bytes, compute_dtype) for the local chip."""
    kind = ""
    try:
        kind = jax.devices()[0].device_kind.lower()
    except Exception:  # pragma: no cover - defensive; assume TPU defaults
        pass
    vmem_cap = None
    try:
        vmem_cap = pltpu.get_tpu_info().vmem_capacity_bytes
    except Exception:  # pragma: no cover - API variance; fall back to defaults
        pass

    is_v5 = "v5" in kind
    # bf16 compute only where the VPU has bf16 VALUs (v6e/v7x); f32 elsewhere.
    if dtype == jnp.bfloat16 and not is_v5:
        compute_dtype = jnp.bfloat16
    else:
        compute_dtype = jnp.float32

    if vmem_cap is not None and vmem_cap <= 64 * 1024 * 1024:
        # v7x-class: 64 MiB VMEM/TC, ~3.2 TB/s HBM -> bigger blocks to amortize
        # per-grid-step overhead; 4 x 8 MiB + labels stays under 44 MiB.
        return 8 << 20, 44 << 20, compute_dtype
    if is_v5:
        # v5e: ~0.82 TB/s HBM; 3 MiB blocks already hide the step overhead.
        return 3 << 20, 32 << 20, compute_dtype
    # v6e (or unknown): 128 MiB physical VMEM gives ample headroom.
    return 6 << 20, 48 << 20, compute_dtype


def _choose_tiles(B, C, itemsize, block_bytes):
    """Pick (tile_b, tile_c) honoring the (8, 128) block constraint, filling
    the lane axis first (full rows when they fit -> one linear DMA per block),
    with tile_b rounded to the dtype's packed-sublane multiple."""
    row_mult = max(8, 32 // itemsize)            # 8 f32 / 16 bf16 / 32 int8
    budget_elems = max(1, block_bytes // itemsize)
    min_rows = min(B, row_mult)

    if C <= 128 or budget_elems // C >= min_rows:
        tile_c = C                                # full rows: contiguous DMA
    else:
        tile_c = min(C, budget_elems // min_rows)
        tile_c = max(128, tile_c - tile_c % 128)

    tile_b = min(B, max(1, budget_elems // tile_c))
    if B <= row_mult:
        tile_b = B
    else:
        tile_b = min(B, max(row_mult, tile_b - tile_b % row_mult))

    # Keep >= 2 grid blocks for big arrays so v7x can shard over its 2 TCs.
    if (pl.cdiv(B, tile_b) == 1 and pl.cdiv(C, tile_c) == 1
            and B * C * itemsize > (2 << 20) and B >= 2 * row_mult):
        half = tile_b // 2
        tile_b = max(row_mult, half - half % row_mult)

    return tile_b, tile_c


def cosface(logits: jax.Array, labels: jax.Array, *, s: float = 64.0,
            m: float = 0.4) -> jax.Array:
    B, C = logits.shape
    labels2d = labels.astype(jnp.int32).reshape(B, 1)
    itemsize = jnp.dtype(logits.dtype).itemsize
    block_bytes, vmem_limit, compute_dtype = _tpu_config(logits.dtype)
    tile_b, tile_c = _choose_tiles(B, C, itemsize, block_bytes)

    kernel = functools.partial(_cosface_kernel, s=s, m=m, tile_c=tile_c,
                               compute_dtype=compute_dtype)
    grid = (pl.cdiv(B, tile_b), pl.cdiv(C, tile_c))  # class axis innermost

    return pl.pallas_call(
        kernel,
        out_shape=jax.ShapeDtypeStruct((B, C), logits.dtype),
        grid_spec=pltpu.PrefetchScalarGridSpec(
            num_scalar_prefetch=0,
            grid=grid,
            in_specs=[
                # labels: block index constant along the class axis -> DMA'd
                # once per row tile, not once per class tile.
                pl.BlockSpec((tile_b, 1), lambda i, j: (i, 0)),
                pl.BlockSpec((tile_b, tile_c), lambda i, j: (i, j)),
            ],
            out_specs=pl.BlockSpec((tile_b, tile_c), lambda i, j: (i, j)),
        ),
        # In-place semantics: write the result over the logits buffer. Only a
        # real in-place update if the caller donates `logits` (see __main__).
        input_output_aliases={1: 0},
        cost_estimate=pl.CostEstimate(
            flops=2 * B * C,
            transcendentals=0,
            bytes_accessed=2 * B * C * itemsize + 4 * B,
        ),
        compiler_params=pltpu.CompilerParams(
            dimension_semantics=("parallel", "parallel"),
            vmem_limit_bytes=vmem_limit,
        ),
    )(labels2d, logits)


if __name__ == "__main__":
    key = jax.random.PRNGKey(0)
    k1, k2, k3 = jax.random.split(key, 3)

    B, C = 16, 256
    s, m = 64.0, 0.4

    logits = jax.random.normal(k1, (B, C), dtype=jnp.float32)
    labels = jax.random.randint(k2, (B,), 0, C, dtype=jnp.int32)
    # Mark a few rows as "ignore" (-1), like the torch code handles.
    ignore = jax.random.bernoulli(k3, 0.25, (B,))
    labels = jnp.where(ignore, -1, labels)

    # Pure-JAX reference, computed BEFORE the kernel call: `logits` is donated
    # below, so the original buffer must not be read afterwards.
    col = jnp.arange(C)[None, :]
    mask = (col == labels[:, None]) & (labels[:, None] != -1)
    ref = (logits - jnp.where(mask, m, 0.0)) * s
    ref = jax.block_until_ready(ref)

    # Donate the logits buffer so input_output_aliases={1: 0} is a real
    # in-place update (no defensive copy of the B x C array).
    cosface_jit = jax.jit(functools.partial(cosface, s=s, m=m),
                          donate_argnums=(0,))
    out = cosface_jit(logits, labels)
    out = jax.block_until_ready(out)

    assert out.shape == (B, C) and out.dtype == jnp.float32
    assert jnp.allclose(out, ref, atol=1e-4), "mismatch vs reference"

    print("KERNEL_OK")
</pallas_src>

<mosaic_0001>
module attributes {stable_mosaic.version = 11 : i64} {
  func.func @_cosface_kernel(%arg0: i32, %arg1: i32, %arg2: memref<16x1xi32, #tpu.memory_space<vmem>>, %arg3: memref<16x256xf32, #tpu.memory_space<vmem>>, %arg4: memref<16x256xf32, #tpu.memory_space<vmem>>) attributes {dimension_semantics = [#tpu.dimension_semantics<parallel>, #tpu.dimension_semantics<parallel>], iteration_bounds = array<i64: 1, 1>, scalar_prefetch = 0 : i64, scratch_operands = 0 : i64, tpu.core_type = #tpu.core_type<tc>, window_params = [{transform_indices = @transform_0, window_bounds = array<i64: 16, 1>}, {transform_indices = @transform_1, window_bounds = array<i64: 16, 256>}, {transform_indices = @transform_2, window_bounds = array<i64: 16, 256>}]} {
    %c0 = arith.constant 0 : index
    %c0_0 = arith.constant 0 : index
    %0 = vector.load %arg2[%c0, %c0_0] : memref<16x1xi32, #tpu.memory_space<vmem>>, vector<16x1xi32>
    %c256_i32 = arith.constant 256 : i32
    %1 = arith.muli %arg1, %c256_i32 : i32
    %2 = vector.broadcast %1 : i32 to vector<16x1xi32>
    %3 = arith.subi %0, %2 : vector<16x1xi32>
    %c-1_i32 = arith.constant -1 : i32
    %4 = vector.broadcast %c-1_i32 : i32 to vector<16x1xi32>
    %5 = arith.cmpi ne, %0, %4 : vector<16x1xi32>
    %c0_1 = arith.constant 0 : index
    %c0_2 = arith.constant 0 : index
    %6 = vector.load %arg3[%c0_1, %c0_2] : memref<16x256xf32, #tpu.memory_space<vmem>>, vector<16x256xf32>
    %7 = tpu.iota {dimensions = array<i32: 1>} : vector<16x256xi32>
    %8 = vector.broadcast %3 : vector<16x1xi32> to vector<16x256xi32>
    %9 = arith.cmpi eq, %7, %8 : vector<16x256xi32>
    %10 = vector.broadcast %5 : vector<16x1xi1> to vector<16x256xi1>
    %11 = arith.andi %9, %10 : vector<16x256xi1>
    %cst = arith.constant 4.000000e-01 : f32
    %12 = vector.broadcast %cst : f32 to vector<16x256xf32>
    %13 = arith.subf %6, %12 : vector<16x256xf32>
    %14 = arith.select %11, %13, %6 : vector<16x256xi1>, vector<16x256xf32>
    %cst_3 = arith.constant 6.400000e+01 : f32
    %15 = vector.broadcast %cst_3 : f32 to vector<16x256xf32>
    %16 = arith.mulf %14, %15 : vector<16x256xf32>
    %c0_4 = arith.constant 0 : index
    %c0_5 = arith.constant 0 : index
    %17 = vector.load %arg4[%c0_4, %c0_5] : memref<16x256xf32, #tpu.memory_space<vmem>>, vector<16x256xf32>
    tpu.vector_store %arg4[%c0_4, %c0_5], %16 {strides = array<i32>} : memref<16x256xf32, #tpu.memory_space<vmem>>, vector<16x256xf32>,
    return
  }
  func.func @transform_0(%arg0: i32, %arg1: i32) -> (i32, i32) {
    %c0_i32 = arith.constant 0 : i32
    %c0_i32_0 = arith.constant 0 : i32
    return %arg0, %c0_i32 : i32, i32
  }
  func.func @transform_1(%arg0: i32, %arg1: i32) -> (i32, i32) {
    %c0_i32 = arith.constant 0 : i32
    return %arg0, %arg1 : i32, i32
  }
  func.func @transform_2(%arg0: i32, %arg1: i32) -> (i32, i32) {
    %c0_i32 = arith.constant 0 : i32
    return %arg0, %arg1 : i32, i32
  }
}

</mosaic_0001>

<bundles_post_ra>
// kernel: cosface.1
= control target key start
LH: loop header
LB: loop body
LE: loop exit
PB: predicated region body
PF: predicated region fallthrough
CT: control target
= control target key end

     0   :  { %7 = vsyncpa [#allocation3], 0  ;;  %s203_s0 = inlined_call_operand.vmem [shape: s32[16,1], index: 0, kind: input, shape index: {}]   ;;  %s204_s1 = inlined_call_operand.hbm [shape: f32[16,256], index: 1, kind: input, shape index: {}, may-alias: {1,2}]   ;;  %s205_s2 = inlined_call_operand.hbm [shape: f32[16,256], index: 2, kind: output, shape index: {}, may-alias: {1,2}]  }
   0x1   :  { %8 = vsyncpa [#allocation4], 0  ;;  %s15_s11 = sshll.u32 %s204_s1, 4  ;;  %s165_s12 = smov [#allocation2]   ;;  %s16_s11 = int_to_ptr.hbm [resolvable:$true] %s15_s11 }
   0x2   :  { %s17_s13 = sshll.u32 %s165_s12, 4  ;;  %s166_s14 = smov 256   ;;  %s18_s13 = int_to_ptr.vmem [resolvable:$true] %s17_s13 }
   0x3   :  { %s167_s15 = smov 16  }
   0x4   :  { %23 = dma.hbm_to_vmem [thread:$0]  %s16_s11, 512, %s18_s13, [#allocation3], %s166_s14, %s166_s14, %s167_s15  }
   0x5   :  { %161 = dma.done.wait [#allocation3], 512  }
   0x6   :  { %162 = vsyncadd [#allocation3], 4294966784  ;;  %v168_v0 = vmov 0   ;;  %v28_v1 = vld [vmem:[%s203_s0] sm:$0xff]  ;;  %v29_v3 = vld [vmem:[%s203_s0 + $0x8] sm:$0xff]  ;;  %v40_v5 = vlaneseq  ;;  %s169_s0 = smov [#allocation5]  }
   0x7   :  { %111 = vset.pattern.permute.xlu0 %v168_v0  ;;  %112 = vset.pattern.permute.xlu1 %v168_v0  ;;  %vm34_vm0 = vcmp.ne.s32.totalorder %v28_v1, 4294967295  ;;  %vm35_vm1 = vcmp.ne.s32.totalorder %v29_v3, 4294967295  ;;  %v36_v8 = vld [vmem:[#allocation2] sm:$0xff]  ;;  %v37_v9 = vld [vmem:[#allocation2 + $0x8] sm:$0xff]  ;;  %v38_v17 = vld [vmem:[#allocation2 + $0x10] sm:$0xff]  ;;  %s87_s19 = sshll.u32 %s169_s0, 4  ;;  %s88_s19 = int_to_ptr.vmem [resolvable:$true] %s87_s19 }
   0x8   :  { %44 = vperm.xlu0 %111, %v28_v1   ;;  %v53_v2 = vsel %vm34_vm0, 1, %v168_v0  ;;  %v54_v4 = vsel %vm35_vm1, 1, %v168_v0  ;;  %v41_v6 = vand.u32 127, %v40_v5  ;;  %v102_v11 = vadd.f32 -0.4, %v36_v8  ;;  %v39_v19 = vld [vmem:[#allocation2 + $0x18] sm:$0xff] }
   0x9   :  { %56 = vperm.xlu1 %112, %v53_v2   ;;  %v103_v12 = vadd.f32 -0.4, %v37_v9  ;;  %v104_v21 = vadd.f32 -0.4, %v38_v17  ;;  %v105_v22 = vadd.f32 -0.4, %v39_v19 }
   0xa   :  { %v42_v7 = vadd.s32 128, %v41_v6  ;;  %s89_s22 = sshll.u32 %s205_s2, 4  ;;  %s90_s22 = int_to_ptr.hbm [resolvable:$true] %s89_s22 }
  0x10   :  { %47 = vperm.xlu0 %111, %v29_v3  }
  0x11   :  { %59 = vperm.xlu1 %112, %v54_v4  }
  0x7a   :  { %v45_v10 = vpop.permute.xlu0 %44 }
  0x7b   :  { %vm49_vm2 = vcmp.eq.s32.totalorder %v41_v6, %v45_v10  ;;  %vm50_vm3 = vcmp.eq.s32.totalorder %v42_v7, %v45_v10  ;;  %v57_v13 = vpop.permute.xlu1 %56 }
  0x7c   :  { %vm61_vm4 = vcmp.eq.s32.totalorder %v57_v13, 1 }
  0x7d   :  { %vm63_vm5 = vmand %vm49_vm2, %vm61_vm4 }
  0x7e   :  { %vm64_vm6 = vmand %vm50_vm3, %vm61_vm4  ;;  %v71_v14 = vsel %vm63_vm5, %v102_v11, %v36_v8 }
  0x7f   :  { %v72_v15 = vsel %vm64_vm6, %v103_v12, %v37_v9  ;;  %v75_v16 = vmul.f32 64.0, %v71_v14 }
  0x80   :  { %v76_v18 = vmul.f32 64.0, %v72_v15 }
  0x81   :  { %79 = vst [vmem:[#allocation5] sm:$0xff] %v75_v16 }
  0x82   :  { %v48_v20 = vpop.permute.xlu0 %47  ;;  %80 = vst [vmem:[#allocation5 + $0x8] sm:$0xff] %v76_v18 }
  0x83   :  { %v60_v23 = vpop.permute.xlu1 %59  ;;  %vm51_vm7 = vcmp.eq.s32.totalorder %v41_v6, %v48_v20  ;;  %vm52_vm9 = vcmp.eq.s32.totalorder %v42_v7, %v48_v20 }
  0x84   :  { %vm62_vm8 = vcmp.eq.s32.totalorder %v60_v23, 1 }
  0x85   :  { %vm65_vm10 = vmand %vm51_vm7, %vm62_vm8 }
  0x86   :  { %vm66_vm11 = vmand %vm52_vm9, %vm62_vm8  ;;  %v73_v24 = vsel %vm65_vm10, %v104_v21, %v38_v17 }
  0x87   :  { %v74_v25 = vsel %vm66_vm11, %v105_v22, %v39_v19  ;;  %v77_v26 = vmul.f32 64.0, %v73_v24 }
  0x88   :  { %v78_v27 = vmul.f32 64.0, %v74_v25 }
  0x89   :  { %81 = vst [vmem:[#allocation5 + $0x10] sm:$0xff] %v77_v26 }
  0x8a   :  { %82 = vst [vmem:[#allocation5 + $0x18] sm:$0xff] %v78_v27 }
  0x8b   :  { %95 = dma.vmem_to_hbm [thread:$0]  %s88_s19, 512, %s90_s22, [#allocation4], %s166_s14, %s166_s14, %s167_s15  }
  0x8c   :  { %163 = dma.done.wait [#allocation4], 512  }
  0x8d   :  { %164 = vsyncadd [#allocation4], 4294966784 }
  0x8e   :  { %100 = vsyncpa [#allocation3], 1 }
  0x8f   :  { %101 = vsyncpa [#allocation4], 1 }

</bundles_post_ra>
